<compile_context>
chip_gen: v5e
topology: v5e:2x2
jax: 0.10.0
libtpu: 0.0.40
codegen_flags: <defaults>
</compile_context>

<pallas_src>
import jax
import jax.numpy as jnp
from jax.experimental import pallas as pl
from jax.experimental.pallas import tpu as pltpu


def _round_up(x, m):
    return (x + m - 1) // m * m


def _pick_spatial_tile(C, S, itemsize, target_bytes=2 << 20):
    """Lane-axis tile size: multiple of 128, sized so C * tS * itemsize ~ target_bytes."""
    tS = max(128, (target_bytes // max(C * itemsize, 1)) // 128 * 128)
    return min(tS, _round_up(S, 128))


# ----------------------- pass 1: global average pool (channel sums) -----------------------

def _pool_kernel(x_ref, sum_ref):
    # x_ref:   (C, tS)  spatial tile of one batch element (spatial axis lane-dense)
    # sum_ref: (C, 1)   float32 running per-channel sum (resident across spatial steps)
    @pl.when(pl.program_id(1) == 0)
    def _():
        sum_ref[...] = jnp.zeros_like(sum_ref)

    sum_ref[...] += jnp.sum(x_ref[...].astype(jnp.float32), axis=1, keepdims=True)


# ----------------------- pass 2: elementwise excite (x * scale) ---------------------------

def _excite_kernel(scale_ref, x_ref, o_ref):
    # scale_ref: (C, 1) float32; x_ref / o_ref: (C, tS) in the storage dtype
    o_ref[...] = (x_ref[...].astype(jnp.float32) * scale_ref[...]).astype(o_ref.dtype)


def squeeze_excitation_3d(x, w1, b1, w2, b2):
    """SqueezeExcitation3d forward.

    x : (N, C, D, H, W)  float32 or bfloat16
    w1: (SQ, C), b1: (SQ,)   -- fc1 (1x1x1 conv weight squeezed to 2-D)
    w2: (C, SQ), b2: (C,)    -- fc2
    """
    N, C, D, H, W = x.shape
    S = D * H * W
    itemsize = jnp.dtype(x.dtype).itemsize

    tS = _pick_spatial_tile(C, S, itemsize)
    S_pad = _round_up(S, tS)
    nS = S_pad // tS

    x2 = x.reshape(N, C, S)
    if S_pad != S:
        # zero padding does not change the channel sums; excite output is sliced back
        x2 = jnp.pad(x2, ((0, 0), (0, 0), (0, S_pad - S)))

    # ---- pass 1: per-(batch, channel) spatial sums, accumulated in float32 ----
    sums = pl.pallas_call(
        _pool_kernel,
        out_shape=jax.ShapeDtypeStruct((N, C, 1), jnp.float32),
        grid=(N, nS),
        in_specs=[
            pl.BlockSpec((pl.Squeezed(), C, tS), lambda n, s: (n, 0, s)),
        ],
        out_specs=pl.BlockSpec((pl.Squeezed(), C, 1), lambda n, s: (n, 0, 0)),
        compiler_params=pltpu.CompilerParams(
            dimension_semantics=("parallel", "arbitrary")),
        cost_estimate=pl.CostEstimate(
            flops=N * C * S_pad,
            transcendentals=0,
            bytes_accessed=N * C * S_pad * itemsize + N * C * 4),
    )(x2)

    # ---- tiny FC1 -> ReLU -> FC2 -> sigmoid in plain JAX (negligible vs HBM traffic) ----
    pooled = sums[..., 0] / jnp.float32(S)                              # (N, C), true divisor
    w1f = jnp.asarray(w1, jnp.float32)
    b1f = jnp.asarray(b1, jnp.float32)
    w2f = jnp.asarray(w2, jnp.float32)
    b2f = jnp.asarray(b2, jnp.float32)
    h = jnp.maximum(pooled @ w1f.T + b1f, 0.0)                          # (N, SQ)
    scale = jax.nn.sigmoid(h @ w2f.T + b2f)                             # (N, C)
    scale3 = scale[:, :, None].astype(jnp.float32)                      # (N, C, 1)

    # ---- pass 2: excite (elementwise, both grid axes parallel for v7x dual-TC) ----
    out2 = pl.pallas_call(
        _excite_kernel,
        out_shape=jax.ShapeDtypeStruct((N, C, S_pad), x.dtype),
        grid=(N, nS),
        in_specs=[
            pl.BlockSpec((pl.Squeezed(), C, 1), lambda n, s: (n, 0, 0)),   # scale
            pl.BlockSpec((pl.Squeezed(), C, tS), lambda n, s: (n, 0, s)),  # x tile
        ],
        out_specs=pl.BlockSpec((pl.Squeezed(), C, tS), lambda n, s: (n, 0, s)),
        compiler_params=pltpu.CompilerParams(
            dimension_semantics=("parallel", "parallel")),
        cost_estimate=pl.CostEstimate(
            flops=N * C * S_pad,
            transcendentals=0,
            bytes_accessed=2 * N * C * S_pad * itemsize),
    )(scale3, x2)

    if S_pad != S:
        out2 = out2[:, :, :S]
    return out2.reshape(N, C, D, H, W)


def _reference(x, w1, b1, w2, b2):
    # pure-JAX reference matching the PyTorch forward (computed in float32)
    xf = x.astype(jnp.float32)
    pooled = jnp.mean(xf, axis=(2, 3, 4))                               # (N, C)
    h = jnp.maximum(pooled @ w1.T + b1, 0.0)                            # (N, SQ)
    s = jax.nn.sigmoid(h @ w2.T + b2)                                   # (N, C)
    return s[:, :, None, None, None] * xf


if __name__ == "__main__":
    key = jax.random.PRNGKey(0)

    # ---- test 1: float32, spatial size a multiple of 128 (no-pad path) ----
    N, C, SQ = 2, 8, 4
    D, H, W = 4, 8, 16
    kx, k1, k2, k3, k4, key = jax.random.split(key, 6)
    x = jax.random.normal(kx, (N, C, D, H, W), dtype=jnp.float32)
    w1 = jax.random.normal(k1, (SQ, C), dtype=jnp.float32) * 0.2        # fc1.weight
    b1 = jax.random.normal(k2, (SQ,), dtype=jnp.float32) * 0.1          # fc1.bias
    w2 = jax.random.normal(k3, (C, SQ), dtype=jnp.float32) * 0.2        # fc2.weight
    b2 = jax.random.normal(k4, (C,), dtype=jnp.float32) * 0.1           # fc2.bias

    out = jax.block_until_ready(squeeze_excitation_3d(x, w1, b1, w2, b2))
    ref = _reference(x, w1, b1, w2, b2)
    assert out.shape == x.shape
    assert jnp.allclose(out, ref, atol=1e-5, rtol=1e-5), "f32 mismatch vs reference"

    # ---- test 2: bfloat16 storage + odd spatial size (padding path) ----
    Nb, Cb, SQb = 1, 6, 3
    Db, Hb, Wb = 3, 5, 7
    kx, k1, k2, k3, k4, key = jax.random.split(key, 6)
    xb = jax.random.normal(kx, (Nb, Cb, Db, Hb, Wb), dtype=jnp.float32).astype(jnp.bfloat16)
    w1b = jax.random.normal(k1, (SQb, Cb), dtype=jnp.float32) * 0.2
    b1b = jax.random.normal(k2, (SQb,), dtype=jnp.float32) * 0.1
    w2b = jax.random.normal(k3, (Cb, SQb), dtype=jnp.float32) * 0.2
    b2b = jax.random.normal(k4, (Cb,), dtype=jnp.float32) * 0.1

    out_b = jax.block_until_ready(squeeze_excitation_3d(xb, w1b, b1b, w2b, b2b))
    ref_b = _reference(xb, w1b, b1b, w2b, b2b)
    assert out_b.shape == xb.shape
    assert out_b.dtype == jnp.bfloat16
    assert jnp.allclose(out_b.astype(jnp.float32), ref_b, atol=3e-2, rtol=3e-2), \
        "bf16 mismatch vs reference"

    print("KERNEL_OK")
</pallas_src>

<mosaic_0001>
module attributes {stable_mosaic.version = 11 : i64} {
  func.func @_pool_kernel(%arg0: i32, %arg1: i32, %arg2: memref<1x8x512xf32, #tpu.memory_space<vmem>>, %arg3: memref<1x8x1xf32, #tpu.memory_space<vmem>>) attributes {dimension_semantics = [#tpu.dimension_semantics<parallel>, #tpu.dimension_semantics<arbitrary>], iteration_bounds = array<i64: 2, 1>, scalar_prefetch = 0 : i64, scratch_operands = 0 : i64, tpu.core_type = #tpu.core_type<tc>, window_params = [{transform_indices = @transform_0, window_bounds = array<i64: 1, 8, 512>}, {transform_indices = @transform_1, window_bounds = array<i64: 1, 8, 1>}]} {
    %c0_i32 = arith.constant 0 : i32
    %0 = arith.cmpi eq, %arg1, %c0_i32 : i32
    %1 = arith.extui %0 : i1 to i32
    %c0_i32_0 = arith.constant 0 : i32
    %2 = arith.cmpi ne, %1, %c0_i32_0 : i32
    scf.if %2 {
      %cst_9 = arith.constant 0.000000e+00 : f32
      %13 = vector.broadcast %cst_9 : f32 to vector<8x1xf32>
      %c0_10 = arith.constant 0 : index
      %c0_11 = arith.constant 0 : index
      %c0_12 = arith.constant 0 : index
      %14 = vector.load %arg3[%c0_10, %c0_11, %c0_12] : memref<1x8x1xf32, #tpu.memory_space<vmem>>, vector<1x8x1xf32>
      %15 = vector.shape_cast %14 : vector<1x8x1xf32> to vector<8x1xf32>
      %16 = vector.shape_cast %13 : vector<8x1xf32> to vector<1x8x1xf32>
      tpu.vector_store %arg3[%c0_10, %c0_11, %c0_12], %16 {strides = array<i32>} : memref<1x8x1xf32, #tpu.memory_space<vmem>>, vector<1x8x1xf32>,
    } else {
    }
    %c0 = arith.constant 0 : index
    %c0_1 = arith.constant 0 : index
    %c0_2 = arith.constant 0 : index
    %3 = vector.load %arg3[%c0, %c0_1, %c0_2] : memref<1x8x1xf32, #tpu.memory_space<vmem>>, vector<1x8x1xf32>
    %4 = vector.shape_cast %3 : vector<1x8x1xf32> to vector<8x1xf32>
    %c0_3 = arith.constant 0 : index
    %c0_4 = arith.constant 0 : index
    %c0_5 = arith.constant 0 : index
    %5 = vector.load %arg2[%c0_3, %c0_4, %c0_5] : memref<1x8x512xf32, #tpu.memory_space<vmem>>, vector<1x8x512xf32>
    %6 = vector.shape_cast %5 : vector<1x8x512xf32> to vector<8x512xf32>
    %cst = arith.constant dense<0.000000e+00> : vector<8xf32>
    %7 = vector.multi_reduction <add>, %6, %cst [1] : vector<8x512xf32> to vector<8xf32>
    %8 = vector.shape_cast %7 : vector<8xf32> to vector<8x1xf32>
    %9 = arith.addf %4, %8 : vector<8x1xf32>
    %c0_6 = arith.constant 0 : index
    %c0_7 = arith.constant 0 : index
    %c0_8 = arith.constant 0 : index
    %10 = vector.load %arg3[%c0_6, %c0_7, %c0_8] : memref<1x8x1xf32, #tpu.memory_space<vmem>>, vector<1x8x1xf32>
    %11 = vector.shape_cast %10 : vector<1x8x1xf32> to vector<8x1xf32>
    %12 = vector.shape_cast %9 : vector<8x1xf32> to vector<1x8x1xf32>
    tpu.vector_store %arg3[%c0_6, %c0_7, %c0_8], %12 {strides = array<i32>} : memref<1x8x1xf32, #tpu.memory_space<vmem>>, vector<1x8x1xf32>,
    return
  }
  func.func @transform_0(%arg0: i32, %arg1: i32) -> (i32, i32, i32) {
    %c0_i32 = arith.constant 0 : i32
    %c0_i32_0 = arith.constant 0 : i32
    return %arg0, %c0_i32, %arg1 : i32, i32, i32
  }
  func.func @transform_1(%arg0: i32, %arg1: i32) -> (i32, i32, i32) {
    %c0_i32 = arith.constant 0 : i32
    %c0_i32_0 = arith.constant 0 : i32
    %c0_i32_1 = arith.constant 0 : i32
    return %arg0, %c0_i32, %c0_i32_0 : i32, i32, i32
  }
}

</mosaic_0001>

<bundles_post_ra>
// kernel: tpu_custom_call.1
= control target key start
LH: loop header
LB: loop body
LE: loop exit
PB: predicated region body
PF: predicated region fallthrough
CT: control target
= control target key end

     0   :  { %6 = vsyncpa [#allocation3], 0  ;;  %s499_s0 = inlined_call_operand.hbm [shape: f32[2,8,512], index: 0, kind: input, shape index: {}]   ;;  %s500_s1 = inlined_call_operand.vmem [shape: f32[2,8,1], index: 1, kind: output, shape index: {}]  }
   0x1   :  { %8 = vsyncpa [#allocation3 + $0x1], 0  ;;  %s409_s6 = smov 0   ;;  %s411_s7 = smov 0  }
   0x2   :  { %s413_s8 = smov 0   ;;  %s415_s9 = smov 0  }
   0x3   :  { %s417_s10 = smov 0   ;;  %s419_s11 = smov 0  }
   0x4 LB: > { %s247_s12 = sadd.s32 4294967295, %s396_s11   ;;  %s26_s13 = sadd.s32 1, %s392_s10  ;;  %s396_s11 = sphi %s419_s11, %s14_s11   ;;  %s392_s10 = sphi %s417_s10, %s507_s10   ;;  %s388_s9 = sphi %s415_s9, %s506_s9   ;;  %s384_s8 = sphi %s413_s8, %s505_s8   ;;  %s380_s7 = sphi %s411_s7, %s504_s7   ;;  %s376_s6 = sphi %s409_s6, %s503_s6  }
   0x5   : > { %p28_p0 = scmp.ge.s32.totalorder %s26_s13, 2  ;;  %s35_s14 = sadd.s32 1, %s384_s8 }
   0x6   : > { %p42_p1 = scmp.ne.s32.totalorder %s384_s8, %s380_s7  ;;  %p43_p2 = scmp.eq.s32.totalorder %s396_s11, 0 }
   0x7   : > { %s509_s13 = smov (%p28_p0, %s26_s13), 0  ;;  %p48_p4 = scmp.ne.s32.totalorder %s380_s7, %s376_s6 }
   0x8   : > { %p445_p3 = por %p43_p2, %p42_p1  ;;  %s30_s16 = ssub.s32 %s392_s10, %s509_s13 }
   0x9   : > { %p49_p5 = scmp.eq.s32.totalorder %s247_s12, 0  ;;  %p33_p6 = scmp.eq.s32.totalorder %s30_s16, 0 }
   0xa   : > { %p266_p8 = scmp.lt.s32.totalorder %s396_s11, 2  ;;  %s98_s19 = sand.u32 1, %s384_s8  }
   0xb   : > { %p452_p7 = por %p49_p5, %p48_p4  ;;  %s259_s20 = sshll.u32 %s392_s10, 5 }
   0xc   : > { %s458_s18 = scalar_select %p33_p6, %s384_s8, %s35_s14  }
   0xd   : > { %s251_s21 = sshll.u32 %s98_s19, 5  ;;  %s109_s24 = scalar_lea.hbm %s499_s0, %s259_s20 }
   0xe   : > { %s111_s25 = sshll.u32 %s109_s24, 4  ;;  %s102_s26 = scalar_lea.vmem [#allocation2], %s251_s21  ;;  %s112_s25 = int_to_ptr.hbm [resolvable:$true] %s111_s25 }
   0xf   : > { %s113_s27 = sshll.u32 %s102_s26, 4  ;;  %p263_p9 = pnand %p266_p8, %p445_p3  ;;  %s114_s27 = int_to_ptr.vmem [resolvable:$true] %s113_s27 }
  0x10   : > { %p254_p10 = scmp.ge.s32.totalorder %s396_s11, 1  ;;  %p118_p11 = scmp.lt.s32.totalorder %s396_s11, 3 }
  0x11   : > { %s99_s28 = scalar_lea.sflag [#allocation3], %s98_s19 }
  0x12   : > { %265 = dma.hbm_to_vmem [thread:$0]  (!%p263_p9), %s112_s25, 512, %s114_s27, %s99_s28  }
  0x13   : > { %p119_p12 = pnand %p254_p10, %p118_p11 }
  0x14   : > { %s124_s29 = sand.u32 (!%p119_p12), 1, %s380_s7  }
  0x15   : > { %122 = sbr.rel (%p119_p12) target bundleno = 153 (0x99), region = 24  ;;  %s255_s30 = sshll.u32 (!%p119_p12), %s124_s29, 5 }
  0x16   : > { %s125_s2 = scalar_lea.sflag (!%p119_p12), [#allocation3], %s124_s29  ;;  %s128_s3 = scalar_lea.vmem (!%p119_p12), [#allocation2], %s255_s30 }
  0x1a   : > { %371 = dma.done.wait (%p452_p7), %s125_s2, 512  }
  0x1b   : > { %373 = vsyncadd (%p452_p7), %s125_s2, 4294966784  ;;  %p148_p13 = scmp.lt.s32.totalorder %s388_s9, 1  ;;  %vm156_vm0 = vcmask 7168   ;;  %v398_v0 = vmov 0.0   ;;  %v159_v1 = vld [vmem:[%s128_s3] sm:$0xff]  ;;  %v160_v2 = vld [vmem:[%s128_s3 + $0x8] sm:$0xff] }
  0x1c   : > { %v161_v3 = vld [vmem:[%s128_s3 + $0x10] sm:$0xff]  ;;  %v163_v4 = vadd.f32 %v160_v2, %v159_v1  ;;  %v162_v5 = vld [vmem:[%s128_s3 + $0x18] sm:$0xff] }
  0x1d   : > { %s511_s9 = smov (!%p148_p13, %s388_s9), 1 }
  0x1e   : > { %s256_s4 = sshll.u32 %s511_s9, 3  ;;  %v164_v6 = vadd.f32 %v163_v4, %v161_v3 }
  0x1f   : > { %s151_s12 = scalar_lea.vmem %s500_s1, %s256_s4 }
  0x20   : > { %157 = vst.msk [vmem:[%s151_s12] sm:$0xff] %vm156_vm0, %v398_v0  ;;  %v165_v7 = vadd.f32 %v164_v6, %v162_v5 }
  0x22   : > { %166 = vadd.xlane.f32.xlu0 %v165_v7 }
  0x27   : > { %v158_v8 = vld [vmem:[%s151_s12] sm:$0xff] }
  0x95   : > { %v167_v9 = vpop.xlane.xlu0 %166 }
  0x96   : > { %v168_v10 = vadd.f32 %v167_v9, %v158_v8 }
  0x98   : > { %170 = vst.msk [vmem:[%s151_s12] sm:$0xff] %vm156_vm0, %v168_v10 }
  0x99 PF: > { %s14_s11 = sadd.s32 1, %s396_s11   ;;  %s503_s6 = smov %s380_s7 }
  0x9a   : > { %p11_p0 = scmp.ge.s32.totalorder %s14_s11, 4   ;;  %s504_s7 = smov %s384_s8 }
  0x9b   : > { %s505_s8 = smov %s458_s18  ;;  %s506_s9 = smov %s392_s10 }
  0x9c   : > { %s507_s10 = smov %s509_s13  ;;  %13 = sbr.rel (!%p11_p0) target bundleno = 4 (0x4), region = 68 }
  0xa1   :  { %190 = vsyncpa [#allocation3], 1 }
  0xa2   :  { %192 = vsyncpa [#allocation3 + $0x1], 1 }

</bundles_post_ra>
